<compile_context>
chip_gen: v6e
topology: v6e:2x2x1
jax: 0.10.0
libtpu: 0.0.40
codegen_flags: <defaults>
</compile_context>

<pallas_src>
import jax
import jax.numpy as jnp
from jax.experimental import pallas as pl
from jax.experimental.pallas import tpu as pltpu


def _make_actor_critic_kernel(num_actions):
    """Kernel factory; num_actions is static (needed for the softmax lane mask)."""

    def kernel(x_ref, w1_ref, b1_ref, w2_ref, b2_ref, out_ref):
        x = x_ref[...]

        # ---- fused layer 1 (critic + actor): one MXU op ----
        h = jnp.dot(x, w1_ref[...], preferred_element_type=jnp.float32) + b1_ref[...]
        h = jnp.maximum(h, 0.0)

        # ---- fused layer 2 (block-diagonal weights): one MXU op ----
        # z[:, 0]      = critic value
        # z[:, 1:1+A]  = actor logits
        # z[:, 1+A:]   = zero padding (zero weights / zero bias)
        z = jnp.dot(h.astype(w2_ref.dtype), w2_ref[...],
                    preferred_element_type=jnp.float32) + b2_ref[...]

        # ---- masked, numerically-stable softmax over the actor columns ----
        col = jax.lax.broadcasted_iota(jnp.int32, z.shape, dimension=1)
        is_logit = jnp.logical_and(col >= 1, col <= num_actions)
        masked = jnp.where(is_logit, z, jnp.float32(-1e30))
        m = jnp.max(masked, axis=-1, keepdims=True)
        e = jnp.exp(masked - m)                 # padded / value lanes -> exp(-huge) = 0
        denom = jnp.sum(e, axis=-1, keepdims=True)
        inv = pl.reciprocal(denom, approx=True)  # EUP vrcp
        inv = inv * (2.0 - denom * inv)          # one Newton step -> f32 accuracy
        probs = e * inv

        # Single lane-dense output slab: col 0 = value, cols 1..A = probs, rest = 0.
        out_ref[...] = jnp.where(col == 0, z, probs).astype(out_ref.dtype)

    return kernel


def fuse_params(params, num_outputs, lane_pad=128):
    """Fold the per-head PyTorch-style params into the fused kernel operands (done once)."""
    hidden = params["wc1"].shape[1]
    a = num_outputs
    out_pad = max(lane_pad, pl.cdiv(1 + a, lane_pad) * lane_pad)

    w1 = jnp.concatenate([params["wc1"], params["wa1"]], axis=1)    # [in, 2H]
    b1 = jnp.concatenate([params["bc1"], params["ba1"]], axis=1)    # [1, 2H]

    w2 = jnp.zeros((2 * hidden, out_pad), jnp.float32)              # block-diagonal, lane-padded
    w2 = w2.at[:hidden, 0:1].set(params["wc2"])
    w2 = w2.at[hidden:, 1:1 + a].set(params["wa2"])
    b2 = jnp.zeros((1, out_pad), jnp.float32)
    b2 = b2.at[:, 0:1].set(params["bc2"])
    b2 = b2.at[:, 1:1 + a].set(params["ba2"])

    return dict(w1=w1, b1=b1, w2=w2, b2=b2, num_actions=a)


def actor_critic_forward(x, fused, *, block_rows=256, compute_dtype=jnp.float32):
    """Fused ActorCritic forward. Returns (probs, value).

    compute_dtype=jnp.bfloat16 is recommended on v6e/v7x for the matmul operands
    (accumulation stays f32).  For best throughput in RL rollouts, stack many
    env/timestep rows into one call: the kernel is overhead-bound at tiny B.
    """
    b, n_in = x.shape
    a = fused["num_actions"]
    out_pad = fused["w2"].shape[1]

    # Row tiling: full-array block for small batches, padded row grid for large ones.
    if b <= block_rows:
        tb, bp = b, b
        x_p = x
    else:
        tb = block_rows
        bp = pl.cdiv(b, tb) * tb
        x_p = jnp.pad(x, ((0, bp - b), (0, 0))) if bp != b else x
    grid = (bp // tb,)

    x_p = x_p.astype(compute_dtype)
    w1 = fused["w1"].astype(compute_dtype)
    w2 = fused["w2"].astype(compute_dtype)
    b1 = fused["b1"].astype(jnp.float32)
    b2 = fused["b2"].astype(jnp.float32)

    def resident(arr):  # weights/biases: same block every grid step -> stay in VMEM
        return pl.BlockSpec(arr.shape, lambda i: (0, 0))

    out = pl.pallas_call(
        _make_actor_critic_kernel(a),
        out_shape=jax.ShapeDtypeStruct((bp, out_pad), jnp.float32),
        grid=grid,
        in_specs=[
            pl.BlockSpec((tb, n_in), lambda i: (i, 0)),   # x rows
            resident(w1), resident(b1),
            resident(w2), resident(b2),
        ],
        out_specs=pl.BlockSpec((tb, out_pad), lambda i: (i, 0)),
        compiler_params=pltpu.CompilerParams(dimension_semantics=("parallel",)),
    )(x_p, w1, b1, w2, b2)

    out = out[:b]
    value = out[:, 0:1]
    probs = out[:, 1:1 + a]
    return probs, value


def init_params(key, num_inputs, num_outputs, hidden_size):
    """Deterministic init mimicking PyTorch nn.Linear default (U(-1/sqrt(fan_in), +))."""
    ks = jax.random.split(key, 8)

    def linear(kw, kb, fan_in, fan_out):
        bound = 1.0 / jnp.sqrt(float(fan_in))
        w = jax.random.uniform(kw, (fan_in, fan_out), jnp.float32, -bound, bound)
        b = jax.random.uniform(kb, (1, fan_out), jnp.float32, -bound, bound)
        return w, b

    wc1, bc1 = linear(ks[0], ks[1], num_inputs, hidden_size)
    wc2, bc2 = linear(ks[2], ks[3], hidden_size, 1)
    wa1, ba1 = linear(ks[4], ks[5], num_inputs, hidden_size)
    wa2, ba2 = linear(ks[6], ks[7], hidden_size, num_outputs)
    return dict(wc1=wc1, bc1=bc1, wc2=wc2, bc2=bc2,
                wa1=wa1, ba1=ba1, wa2=wa2, ba2=ba2)


def _reference(x, p):
    hc = jnp.maximum(x @ p["wc1"] + p["bc1"], 0.0)
    value = hc @ p["wc2"] + p["bc2"]
    ha = jnp.maximum(x @ p["wa1"] + p["ba1"], 0.0)
    logits = ha @ p["wa2"] + p["ba2"]
    probs = jax.nn.softmax(logits, axis=1)
    return probs, value


if __name__ == "__main__":
    num_inputs, num_outputs, hidden_size = 8, 4, 32
    B = 2

    key = jax.random.PRNGKey(0)
    kx, kp = jax.random.split(key)
    x = jax.random.normal(kx, (B, num_inputs), jnp.float32)
    params = init_params(kp, num_inputs, num_outputs, hidden_size)
    fused = fuse_params(params, num_outputs)   # one-time fusion, outside the kernel

    probs, value = actor_critic_forward(x, fused)
    jax.block_until_ready((probs, value))

    # correctness check against a pure-JAX reference
    ref_probs, ref_value = _reference(x, params)
    assert probs.shape == (B, num_outputs) and value.shape == (B, 1)
    assert jnp.allclose(probs, ref_probs, atol=1e-5, rtol=1e-5)
    assert jnp.allclose(value, ref_value, atol=1e-5, rtol=1e-5)
    assert jnp.allclose(jnp.sum(probs, axis=1), 1.0, atol=1e-5)

    # TODO(synk): torch.distributions.Categorical has no Pallas equivalent;
    # the kernel returns the distribution parameters (probs) instead.
    print("KERNEL_OK")
</pallas_src>

<mosaic_0001>
module attributes {stable_mosaic.version = 11 : i64} {
  func.func @kernel(%arg0: i32, %arg1: memref<2x8xf32, #tpu.memory_space<vmem>>, %arg2: memref<8x64xf32, #tpu.memory_space<vmem>>, %arg3: memref<1x64xf32, #tpu.memory_space<vmem>>, %arg4: memref<64x128xf32, #tpu.memory_space<vmem>>, %arg5: memref<1x128xf32, #tpu.memory_space<vmem>>, %arg6: memref<2x128xf32, #tpu.memory_space<vmem>>) attributes {dimension_semantics = [#tpu.dimension_semantics<parallel>], iteration_bounds = array<i64: 1>, scalar_prefetch = 0 : i64, scratch_operands = 0 : i64, tpu.core_type = #tpu.core_type<tc>, window_params = [{transform_indices = @transform_0, window_bounds = array<i64: 2, 8>}, {pipeline_mode = #tpu.pipeline_mode<synchronous>, transform_indices = @transform_1, window_bounds = array<i64: 8, 64>}, {pipeline_mode = #tpu.pipeline_mode<synchronous>, transform_indices = @transform_2, window_bounds = array<i64: 1, 64>}, {pipeline_mode = #tpu.pipeline_mode<synchronous>, transform_indices = @transform_3, window_bounds = array<i64: 64, 128>}, {pipeline_mode = #tpu.pipeline_mode<synchronous>, transform_indices = @transform_4, window_bounds = array<i64: 1, 128>}, {transform_indices = @transform_5, window_bounds = array<i64: 2, 128>}]} {
    %c0 = arith.constant 0 : index
    %c0_0 = arith.constant 0 : index
    %0 = vector.load %arg1[%c0, %c0_0] : memref<2x8xf32, #tpu.memory_space<vmem>>, vector<2x8xf32>
    %c0_1 = arith.constant 0 : index
    %c0_2 = arith.constant 0 : index
    %1 = vector.load %arg2[%c0_1, %c0_2] : memref<8x64xf32, #tpu.memory_space<vmem>>, vector<8x64xf32>
    %cst = arith.constant dense<0.000000e+00> : vector<2x64xf32>
    %2 = tpu.matmul %0, %1, %cst {dimension_numbers = #tpu.dot_dimension_numbers<[1], [0], [0], [1], [0, 0, 1, 1], [], []>} : vector<2x8xf32>, vector<8x64xf32>, vector<2x64xf32> -> vector<2x64xf32>
    %c0_3 = arith.constant 0 : index
    %c0_4 = arith.constant 0 : index
    %3 = vector.load %arg3[%c0_3, %c0_4] : memref<1x64xf32, #tpu.memory_space<vmem>>, vector<1x64xf32>
    %4 = vector.broadcast %3 : vector<1x64xf32> to vector<2x64xf32>
    %5 = arith.addf %2, %4 : vector<2x64xf32>
    %cst_5 = arith.constant 0.000000e+00 : f32
    %6 = vector.broadcast %cst_5 : f32 to vector<2x64xf32>
    %7 = arith.maximumf %5, %6 : vector<2x64xf32>
    %c0_6 = arith.constant 0 : index
    %c0_7 = arith.constant 0 : index
    %8 = vector.load %arg4[%c0_6, %c0_7] : memref<64x128xf32, #tpu.memory_space<vmem>>, vector<64x128xf32>
    %cst_8 = arith.constant dense<0.000000e+00> : vector<2x128xf32>
    %9 = tpu.matmul %7, %8, %cst_8 {dimension_numbers = #tpu.dot_dimension_numbers<[1], [0], [0], [1], [0, 0, 1, 1], [], []>} : vector<2x64xf32>, vector<64x128xf32>, vector<2x128xf32> -> vector<2x128xf32>
    %c0_9 = arith.constant 0 : index
    %c0_10 = arith.constant 0 : index
    %10 = vector.load %arg5[%c0_9, %c0_10] : memref<1x128xf32, #tpu.memory_space<vmem>>, vector<1x128xf32>
    %11 = vector.broadcast %10 : vector<1x128xf32> to vector<2x128xf32>
    %12 = arith.addf %9, %11 : vector<2x128xf32>
    %13 = tpu.iota {dimensions = array<i32: 1>} : vector<2x128xi32>
    %c1_i32 = arith.constant 1 : i32
    %14 = vector.broadcast %c1_i32 : i32 to vector<2x128xi32>
    %15 = arith.cmpi sge, %13, %14 : vector<2x128xi32>
    %c4_i32 = arith.constant 4 : i32
    %16 = vector.broadcast %c4_i32 : i32 to vector<2x128xi32>
    %17 = arith.cmpi sle, %13, %16 : vector<2x128xi32>
    %18 = arith.andi %15, %17 : vector<2x128xi1>
    %cst_11 = arith.constant -1.000000e+30 : f32
    %19 = vector.broadcast %cst_11 : f32 to vector<2x128xf32>
    %20 = arith.select %18, %12, %19 : vector<2x128xi1>, vector<2x128xf32>
    %cst_12 = arith.constant dense<0xFF800000> : vector<2xf32>
    %21 = vector.multi_reduction <maximumf>, %20, %cst_12 [1] : vector<2x128xf32> to vector<2xf32>
    %22 = vector.shape_cast %21 : vector<2xf32> to vector<2x1xf32>
    %23 = vector.broadcast %22 : vector<2x1xf32> to vector<2x128xf32>
    %24 = arith.subf %20, %23 : vector<2x128xf32>
    %25 = math.exp %24 : vector<2x128xf32>
    %cst_13 = arith.constant dense<0.000000e+00> : vector<2xf32>
    %26 = vector.multi_reduction <add>, %25, %cst_13 [1] : vector<2x128xf32> to vector<2xf32>
    %27 = vector.shape_cast %26 : vector<2xf32> to vector<2x1xf32>
    %28 = tpu.reciprocal %27 {approx = true} : vector<2x1xf32> -> vector<2x1xf32>
    %29 = arith.mulf %27, %28 : vector<2x1xf32>
    %cst_14 = arith.constant 2.000000e+00 : f32
    %30 = vector.broadcast %cst_14 : f32 to vector<2x1xf32>
    %31 = arith.subf %30, %29 : vector<2x1xf32>
    %32 = arith.mulf %28, %31 : vector<2x1xf32>
    %33 = vector.broadcast %32 : vector<2x1xf32> to vector<2x128xf32>
    %34 = arith.mulf %25, %33 : vector<2x128xf32>
    %c0_i32 = arith.constant 0 : i32
    %35 = vector.broadcast %c0_i32 : i32 to vector<2x128xi32>
    %36 = arith.cmpi eq, %13, %35 : vector<2x128xi32>
    %37 = arith.select %36, %12, %34 : vector<2x128xi1>, vector<2x128xf32>
    %c0_15 = arith.constant 0 : index
    %c0_16 = arith.constant 0 : index
    %38 = vector.load %arg6[%c0_15, %c0_16] : memref<2x128xf32, #tpu.memory_space<vmem>>, vector<2x128xf32>
    tpu.vector_store %arg6[%c0_15, %c0_16], %37 {strides = array<i32>} : memref<2x128xf32, #tpu.memory_space<vmem>>, vector<2x128xf32>,
    return
  }
  func.func @transform_0(%arg0: i32) -> (i32, i32) {
    %c0_i32 = arith.constant 0 : i32
    %c0_i32_0 = arith.constant 0 : i32
    return %arg0, %c0_i32 : i32, i32
  }
  func.func @transform_1(%arg0: i32) -> (i32, i32) {
    %c0_i32 = arith.constant 0 : i32
    %c0_i32_0 = arith.constant 0 : i32
    %c0_i32_1 = arith.constant 0 : i32
    return %c0_i32, %c0_i32_0 : i32, i32
  }
  func.func @transform_2(%arg0: i32) -> (i32, i32) {
    %c0_i32 = arith.constant 0 : i32
    %c0_i32_0 = arith.constant 0 : i32
    %c0_i32_1 = arith.constant 0 : i32
    return %c0_i32, %c0_i32_0 : i32, i32
  }
  func.func @transform_3(%arg0: i32) -> (i32, i32) {
    %c0_i32 = arith.constant 0 : i32
    %c0_i32_0 = arith.constant 0 : i32
    %c0_i32_1 = arith.constant 0 : i32
    return %c0_i32, %c0_i32_0 : i32, i32
  }
  func.func @transform_4(%arg0: i32) -> (i32, i32) {
    %c0_i32 = arith.constant 0 : i32
    %c0_i32_0 = arith.constant 0 : i32
    %c0_i32_1 = arith.constant 0 : i32
    return %c0_i32, %c0_i32_0 : i32, i32
  }
  func.func @transform_5(%arg0: i32) -> (i32, i32) {
    %c0_i32 = arith.constant 0 : i32
    %c0_i32_0 = arith.constant 0 : i32
    return %arg0, %c0_i32 : i32, i32
  }
}

</mosaic_0001>

<bundles_post_ra>
// kernel: tpu_custom_call.1
= control target key start
LH: loop header
LB: loop body
LE: loop exit
PB: predicated region body
PF: predicated region fallthrough
CT: control target
= control target key end

     0   :  { %10 = vsyncpa [#allocation3], 0  ;;  %s464_s0 = inlined_call_operand.hbm [shape: f32[2,8], index: 0, kind: input, shape index: {}]   ;;  %s465_s1 = inlined_call_operand.hbm [shape: f32[8,64], index: 1, kind: input, shape index: {}]   ;;  %s466_s2 = inlined_call_operand.vmem [shape: f32[1,64], index: 2, kind: input, shape index: {}]   ;;  %s467_s3 = inlined_call_operand.hbm [shape: f32[64,128], index: 3, kind: input, shape index: {}]   ;;  %s468_s4 = inlined_call_operand.vmem [shape: f32[1,128], index: 4, kind: input, shape index: {}]   ;;  %s469_s5 = inlined_call_operand.hbm [shape: f32[2,128], index: 5, kind: output, shape index: {}]  }
   0x1   :  { %11 = vsyncpa [#allocation6], 0 }
   0x2   :  { %12 = vsyncpa [#allocation4], 0  ;;  %s408_s18 = smov [#allocation5]   ;;  %s409_s20 = smov [#allocation2]  }
   0x3   :  { %s29_s19 = sshll.u32 %s408_s18, 4  ;;  %s19_s21 = sshll.u32 %s409_s20, 4  ;;  %s30_s19 = int_to_ptr.vmem [resolvable:$true] %s29_s19  ;;  %s20_s21 = int_to_ptr.vmem [resolvable:$true] %s19_s21 }
   0x4   :  { %s330_s22 = scalar_lea.vmem %s30_s19, 128  ;;  %p335_p1 = scmp.lt.s32.totalorder %s30_s19, %s30_s19 }
   0x5   :  { %p331_p0 = scmp.ne.s32.totalorder %s30_s19, %s330_s22  ;;  %p336_p2 = scmp.lt.s32.totalorder %s330_s22, %s330_s22 }
   0x7   :  { %p337_p3 = por %p336_p2, %p335_p1 }
   0x9   :  { %p338_p4 = pnand %p337_p3, %p331_p0 }
   0xb   :  { %341 = shalt.err (!%p338_p4)
}
   0xc   :  { %32 = dma.hbm_to_vmem [thread:$0]  %s465_s1, 128, %s30_s19, [#allocation6]  }
   0xd   :  { %s350_s25 = scalar_lea.vmem %s20_s21, 32  ;;  %p355_p6 = scmp.lt.s32.totalorder %s20_s21, %s20_s21 }
   0xe   :  { %p351_p5 = scmp.ne.s32.totalorder %s20_s21, %s350_s25  ;;  %p356_p7 = scmp.lt.s32.totalorder %s350_s25, %s350_s25 }
  0x10   :  { %p357_p8 = por %p356_p7, %p355_p6 }
  0x12   :  { %p358_p9 = pnand %p357_p8, %p351_p5 }
  0x14   :  { %361 = shalt.err (!%p358_p9)
}
  0x15   :  { %22 = dma.hbm_to_vmem [thread:$0]  %s464_s0, 32, %s20_s21, [#allocation3]  }
  0x16   :  { %s410_s28 = smov [#allocation7]  }
  0x17   :  { %s40_s29 = sshll.u32 %s410_s28, 4  ;;  %s41_s29 = int_to_ptr.vmem [resolvable:$true] %s40_s29 }
  0x18   :  { %s370_s30 = scalar_lea.vmem %s41_s29, 1024  ;;  %p375_p11 = scmp.lt.s32.totalorder %s41_s29, %s41_s29 }
  0x19   :  { %p371_p10 = scmp.ne.s32.totalorder %s41_s29, %s370_s30  ;;  %p376_p12 = scmp.lt.s32.totalorder %s370_s30, %s370_s30 }
  0x1b   :  { %p377_p13 = por %p376_p12, %p375_p11 }
  0x1d   :  { %p378_p0 = pnand %p377_p13, %p371_p10 }
  0x1f   :  { %381 = shalt.err (!%p378_p0)
}
  0x20   :  { %s411_s1 = smov 128   ;;  %s412_s6 = smov 8  }
  0x21   :  { %46 = dma.hbm_to_vmem [thread:$0]  %s467_s3, 1024, %s41_s29, [#allocation6], %s411_s1, %s411_s1, %s412_s6  }
  0x22   :  { %402 = dma.done.wait [#allocation3], 32  }
  0x23   :  { %403 = vsyncadd [#allocation3], 4294967264 }
  0x24   :  { %404 = dma.done.wait [#allocation6], 1152  }
  0x25   :  { %405 = vsyncadd [#allocation6], 4294966144  ;;  %v413_v0 = vmov 0.0   ;;  %vm414_vm0 = vmmov 0   ;;  %vm67_vm1 = vcmask 64512   ;;  %v59_v1 = vld [vmem:[#allocation5] sm:$0xff]  ;;  %v231_v16 = vlaneseq }
  0x26   :  { %286 = vmatprep.subr.mxu0 %v413_v0  ;;  %288 = vmatprep.mubr.msk.f32.mxu0 %vm414_vm0, %v413_v0  ;;  %v58_v2 = vld [vmem:[#allocation2] sm:$0x3]  ;;  %v149_v3 = vld [vmem:[#allocation7 + $0x38] sm:$0xff]  ;;  %v147_v5 = vld [vmem:[#allocation7 + $0x28] sm:$0xff]  ;;  %vm157_vm2 = vcmask 523264   ;;  %vm237_vm6 = vcmask 1041408  }
  0x27   :  { %291 = vmatprep.subr.mxu1 %v413_v0  ;;  %307 = vmatprep.mubr.msk.f32.mxu1 %vm414_vm0, %v413_v0  ;;  %v148_v4 = vld [vmem:[#allocation7 + $0x30] sm:$0xff]  ;;  %v146_v6 = vld [vmem:[#allocation7 + $0x20] sm:$0xff]  ;;  %v145_v7 = vld [vmem:[#allocation7 + $0x18] sm:$0xff]  ;;  %v232_v17 = vand.u32 127, %v231_v16 }
  0x28   :  { %287 = vmatpush3.msra.mxu0 %v59_v1  ;;  %292 = vmatpush3.msra.mxu1 %v149_v3  ;;  %v144_v8 = vld [vmem:[#allocation7 + $0x10] sm:$0xff]  ;;  %v143_v9 = vld [vmem:[#allocation7 + $0x8] sm:$0xff]  ;;  %v142_v10 = vld [vmem:[#allocation7] sm:$0xff] }
  0x29   :  { %289 = vmatmul.mubr.msk.f32.vlgmr.msra.gmra.mxu0 %vm67_vm1, %v58_v2  ;;  %293 = vmatprep.subr.mxu1 %v413_v0  ;;  %v271_v11 = vld [vmem:[%s466_s2] ss:$0 sm:$0xff]  ;;  %vm233_vm3 = vcmp.ge.s32.totalorder %v232_v17, 1  ;;  %vm234_vm4 = vcmp.le.s32.totalorder %v232_v17, 4  ;;  %s415_s2 = smov [#allocation8]   ;;  %vm252_vm7 = vcmp.eq.s32.totalorder %v232_v17, 0 }
  0x2a   :  { %294 = vmatpush3.msra.mxu1 %v148_v4  ;;  %v273_v18 = vld [vmem:[%s468_s4] ss:$0 sm:$0xff]  ;;  %vm235_vm5 = vmand %vm233_vm3, %vm234_vm4  ;;  %s261_s4 = sshll.u32 %s415_s2, 4  ;;  %s262_s4 = int_to_ptr.vmem [resolvable:$true] %s261_s4 }
  0x2b   :  { %295 = vmatprep.subr.mxu1 %v413_v0  ;;  %s382_s11 = scalar_lea.vmem %s262_s4, 32  ;;  %p387_p2 = scmp.lt.s32.totalorder %s262_s4, %s262_s4 }
  0x2c   :  { %296 = vmatpush3.msra.mxu1 %v147_v5  ;;  %p383_p1 = scmp.ne.s32.totalorder %s262_s4, %s382_s11  ;;  %p388_p3 = scmp.lt.s32.totalorder %s382_s11, %s382_s11 }
  0x2d   :  { %297 = vmatprep.subr.mxu1 %v413_v0 }
  0x2e   :  { %298 = vmatpush3.msra.mxu1 %v146_v6  ;;  %p389_p4 = por %p388_p3, %p387_p2 }
  0x2f   :  { %299 = vmatprep.subr.mxu1 %v413_v0 }
  0x30   :  { %300 = vmatpush3.msra.mxu1 %v145_v7  ;;  %p390_p5 = pnand %p389_p4, %p383_p1 }
  0x31   :  { %301 = vmatprep.subr.mxu1 %v413_v0 }
  0x32   :  { %302 = vmatpush3.msra.mxu1 %v144_v8 }
  0x33   :  { %303 = vmatprep.subr.mxu1 %v413_v0 }
  0x34   :  { %304 = vmatpush3.msra.mxu1 %v143_v9 }
  0x35   :  { %305 = vmatprep.subr.mxu1 %v413_v0 }
  0x36   :  { %306 = vmatpush3.msra.mxu1 %v142_v10 }
  0xe9   :  { %v137_v12 = vpop.f32.mrf.mxu0 }
  0xea   :  { %v138_v13 = vadd.f32 %v271_v11, %v137_v12 }
  0xeb   :  { %v290_v14 = vpop.f32.mrf.mxu0 }
  0xec   :  { %v141_v15 = vmax.f32 %v138_v13, 0.0 }
  0xee   :  { %308 = vmatmul.mubr.msk.f32.vlgmr.msra.gmra.mxu1 %vm157_vm2, %v141_v15 }
 0x1ae   :  { %v227_v19 = vpop.f32.mrf.mxu1 }
 0x1af   :  { %v228_v20 = vadd.f32 %v273_v18, %v227_v19 }
 0x1b0   :  { %v309_v21 = vpop.f32.mrf.mxu1 }
 0x1b1   :  { %v236_v22 = vsel %vm235_vm5, %v228_v20, -1e+30 }
 0x1b2   :  { %v238_v23 = vsel %vm237_vm6, %v236_v22, -inf }
 0x1b3   :  { %239 = vmax.xlane.f32.xlu0 %v238_v23 }
 0x23c   :  { %v240_v24 = vpop.xlane.xlu0 %239 }
 0x23d   :  { %v241_v25 = vsub.f32 %v236_v22, %v240_v24 }
 0x23f   :  { %v242_v26 = vmul.f32 1.442695, %v241_v25 }
 0x241   :  { %318 = vpow2.f32 %v242_v26 }
 0x24e   :  { %v319_v27 = vpop.eup %318 }
 0x24f   :  { %v244_v28 = vsel %vm237_vm6, %v319_v27, 0.0 }
 0x250   :  { %245 = vadd.xlane.f32.xlu0 %v244_v28 }
 0x2d9   :  { %v246_v29 = vpop.xlane.xlu0 %245 }
 0x2da   :  { %320 = vrcp.f32 %v246_v29 }
 0x2e7   :  { %v321_v30 = vpop.eup %320 }
 0x2e8   :  { %v248_v31 = vmul.f32 %v321_v30, %v246_v29 }
 0x2ea   :  { %v249_v32 = vsub.f32 2.0, %v248_v31 }
 0x2ec   :  { %v250_v33 = vmul.f32 %v321_v30, %v249_v32 }
 0x2ee   :  { %v251_v34 = vmul.f32 %v319_v27, %v250_v33 }
 0x2f0   :  { %v253_v35 = vsel %vm252_vm7, %v228_v20, %v251_v34 }
 0x2f1   :  { %254 = vst [vmem:[#allocation8] sm:$0x3] %v253_v35 }
 0x2f2   :  { %393 = shalt.err (!%p390_p5)
}
 0x2f3   :  { %264 = dma.vmem_to_hbm [thread:$0]  %s262_s4, 32, %s469_s5, [#allocation4]  }
 0x2f4   :  { %406 = dma.done.wait [#allocation4], 32  }
 0x2f5   :  { %407 = vsyncadd [#allocation4], 4294967264 }
 0x2f6   :  { %268 = vsyncpa [#allocation3], 1 }
 0x2f7   :  { %269 = vsyncpa [#allocation6], 1 }
 0x2f8   :  { %270 = vsyncpa [#allocation4], 1 }

</bundles_post_ra>
